<compile_context>
chip_gen: v6e
topology: v6e:2x2x1
jax: 0.10.0
libtpu: 0.0.40
codegen_flags: <defaults>
</compile_context>

<pallas_src>
import functools

import jax
import jax.numpy as jnp
from jax.experimental import pallas as pl
from jax.experimental.pallas import tpu as pltpu

_LANES = 128
_SUBLANES = 8
_CHUNK = 32          # rows streamed per inner-loop iteration (4 f32 vregs/input)


def _dice_partial_kernel(x_ref, t_ref, inter_ref, st_ref, *,
                         tm, chunk, steps, valid_rows, needs_mask):
    """Accumulate (8,128) lane-parallel partial sums of sig(x)*t and sig(x)+t."""
    s_idx = pl.program_id(1)

    @pl.when(s_idx == 0)
    def _():
        inter_ref[...] = jnp.zeros_like(inter_ref)
        st_ref[...] = jnp.zeros_like(st_ref)

    n_chunks = tm // chunk
    fold = chunk // _SUBLANES

    def accumulate(row0):
        # row0 is None for fully-valid blocks (no masking); otherwise it is the
        # logical first row of this block and rows >= valid_rows are squashed
        # with a select (handles the partial last block, the unspecified data
        # in its out-of-bounds region, and phantom blocks on the padded grid).
        masked = row0 is not None

        def chunk_body(c, carry):
            acc_i, acc_s = carry
            lo = pl.multiple_of(c * chunk, chunk)
            x = x_ref[pl.ds(lo, chunk), :].astype(jnp.float32)
            t = t_ref[pl.ds(lo, chunk), :].astype(jnp.float32)
            sig = jax.nn.sigmoid(x)
            prod = sig * t                       # -> intersection
            both = sig + t                       # sum(s) + sum(t) == sum(s + t)
            if masked:
                rid = row0 + lo + jax.lax.broadcasted_iota(
                    jnp.int32, (chunk, _LANES), 0)
                ok = rid < valid_rows
                prod = jnp.where(ok, prod, 0.0)
                both = jnp.where(ok, both, 0.0)
            # Fold the (chunk,128) values onto (8,128) with vreg-aligned
            # static slices (plain VPU adds, no cross-lane work).
            pi = prod[0:_SUBLANES, :]
            bi = both[0:_SUBLANES, :]
            for g in range(1, fold):
                a = g * _SUBLANES
                pi = pi + prod[a:a + _SUBLANES, :]
                bi = bi + both[a:a + _SUBLANES, :]
            return acc_i + pi, acc_s + bi

        zeros = jnp.zeros((_SUBLANES, _LANES), jnp.float32)
        acc_i, acc_s = jax.lax.fori_loop(0, n_chunks, chunk_body, (zeros, zeros))
        # Touch the output refs once per grid step, not once per chunk.
        inter_ref[...] += acc_i
        st_ref[...] += acc_s

    if needs_mask:
        p_idx = pl.program_id(0)
        blk = p_idx * steps + s_idx              # logical block index
        row0 = blk * tm
        fully_valid = row0 + tm <= valid_rows

        @pl.when(fully_valid)
        def _():
            accumulate(None)

        @pl.when(jnp.logical_not(fully_valid))
        def _():
            accumulate(row0)
    else:
        accumulate(None)


def _round_down(v, m):
    return (v // m) * m


def dice_loss(inputs, targets, smooth=1.0, *, max_block_rows=2048):
    """Pallas implementation of DiceLoss.forward (returns a scalar f32)."""
    n = inputs.size
    x_flat = inputs.reshape(-1)
    t_flat = targets.reshape(-1)
    if not jnp.issubdtype(x_flat.dtype, jnp.floating):
        x_flat = x_flat.astype(jnp.float32)

    rows = max(pl.cdiv(n, _LANES), _SUBLANES)
    n_arr = rows * _LANES
    if n_arr != n:
        # Minimal one-time pad only for non-128-aligned (or tiny) sizes.
        # finfo.min logits -> sigmoid == exactly 0, targets 0 -> padded lanes
        # contribute nothing and no mask stream touches HBM.
        # TODO(synk): for very large ragged inputs replace this pad with
        # memory_space=pl.ANY + an exact-length manual DMA for the final tile
        # so the arrays are never re-copied in HBM before the kernel.
        x_flat = jnp.pad(x_flat, (0, n_arr - n),
                         constant_values=jnp.finfo(x_flat.dtype).min)
        t_flat = jnp.pad(t_flat, (0, n_arr - n), constant_values=0)
    x2 = x_flat.reshape(rows, _LANES)             # free for contiguous arrays
    t2 = t_flat.reshape(rows, _LANES)

    # Block rows: multiple of the streaming chunk, never larger than the array
    # (so only the last block may extend past the end), capped at
    # max_block_rows (2048 rows = 1 MiB f32 per input block).
    tm_cap = max(_SUBLANES, _round_down(int(max_block_rows), _SUBLANES))
    tm_full = min(tm_cap, _round_down(rows, _SUBLANES))
    if tm_full >= _CHUNK:
        tm = _round_down(tm_full, _CHUNK)
        chunk = _CHUNK
    else:
        tm = tm_full
        chunk = tm_full
    total_blocks = pl.cdiv(rows, tm)

    # Always expose two partitions on the leading "parallel" axis when there is
    # more than one block so v7x can shard across both TensorCores; any phantom
    # trailing block is clamped in the index_map and masked to zero in-kernel.
    n_par = 2 if total_blocks >= 2 else 1
    steps = pl.cdiv(total_blocks, n_par)
    needs_mask = (rows % tm != 0) or (n_par * steps != total_blocks)

    if n_par * steps == total_blocks:
        in_idx = lambda p, s: (p * steps + s, 0)
    else:
        last = total_blocks - 1
        in_idx = lambda p, s: (jnp.minimum(p * steps + s, last), 0)

    in_spec = pl.BlockSpec((tm, _LANES), in_idx)
    out_spec = pl.BlockSpec((_SUBLANES, _LANES), lambda p, s: (p, 0))
    out_sds = jax.ShapeDtypeStruct((n_par * _SUBLANES, _LANES), jnp.float32)

    in_bytes = int(n_arr) * (x2.dtype.itemsize + t2.dtype.itemsize)
    out_bytes = 2 * n_par * _SUBLANES * _LANES * 4
    cost = pl.CostEstimate(flops=5 * int(n_arr),
                           transcendentals=int(n_arr),
                           bytes_accessed=in_bytes + out_bytes)

    kernel = functools.partial(_dice_partial_kernel, tm=tm, chunk=chunk,
                               steps=steps, valid_rows=rows,
                               needs_mask=needs_mask)

    inter_part, st_part = pl.pallas_call(
        kernel,
        out_shape=(out_sds, out_sds),
        grid_spec=pltpu.PrefetchScalarGridSpec(
            num_scalar_prefetch=0,
            grid=(n_par, steps),
            in_specs=[in_spec, in_spec],
            out_specs=[out_spec, out_spec],
        ),
        compiler_params=pltpu.CompilerParams(
            dimension_semantics=("parallel", "arbitrary")),
        cost_estimate=cost,
    )(x2, t2)

    # Tiny final cross-lane reduction (n_par*8*128 floats each) + dice formula.
    intersection = jnp.sum(inter_part)
    st_sum = jnp.sum(st_part)
    dice = (2.0 * intersection + smooth) / (st_sum + smooth)
    return (1.0 - dice).astype(jnp.float32)


def dice_loss_ref(inputs, targets, smooth=1.0):
    s = jax.nn.sigmoid(inputs.astype(jnp.float32)).reshape(-1)
    t = targets.astype(jnp.float32).reshape(-1)
    inter = jnp.sum(s * t)
    dice = (2.0 * inter + smooth) / (jnp.sum(s) + jnp.sum(t) + smooth)
    return 1.0 - dice


if __name__ == "__main__":
    key = jax.random.PRNGKey(0)

    # (shape, max_block_rows): small block caps exercise the two-partition,
    # phantom-block and partial-block masking paths at small sizes.
    cases = [
        ((2, 4, 16, 16), 2048),   # 2048 elems: 128-aligned, single block
        ((2, 3, 17, 19), 2048),   # 1938 elems: ragged tail -> pad path
        ((4, 4, 64, 64), 2048),   # 65536 elems: streaming inner loop (16 chunks)
        ((3, 4, 32, 32), 32),     # 3 blocks: 2 partitions + masked phantom block
        ((5, 3, 24, 24), 32),     # ragged rows: pad + partial block + phantom
    ]
    for i, (shape, max_rows) in enumerate(cases):
        k1, k2 = jax.random.split(jax.random.fold_in(key, i))
        x = jax.random.normal(k1, shape, dtype=jnp.float32)
        t = (jax.random.uniform(k2, shape) > 0.5).astype(jnp.float32)

        fn = jax.jit(functools.partial(dice_loss, max_block_rows=max_rows))
        out = jax.block_until_ready(fn(x, t))
        ref = dice_loss_ref(x, t)
        assert jnp.allclose(out, ref, atol=1e-4, rtol=1e-4), (shape, out, ref)

    print("KERNEL_OK")
</pallas_src>

<mosaic_0001>
module attributes {stable_mosaic.version = 11 : i64} {
  func.func @_dice_partial_kernel(%arg0: i32, %arg1: i32, %arg2: memref<16x128xf32, #tpu.memory_space<vmem>>, %arg3: memref<16x128xf32, #tpu.memory_space<vmem>>, %arg4: memref<8x128xf32, #tpu.memory_space<vmem>>, %arg5: memref<8x128xf32, #tpu.memory_space<vmem>>) attributes {dimension_semantics = [#tpu.dimension_semantics<parallel>, #tpu.dimension_semantics<arbitrary>], iteration_bounds = array<i64: 1, 1>, scalar_prefetch = 0 : i64, scratch_operands = 0 : i64, tpu.core_type = #tpu.core_type<tc>, window_params = [{transform_indices = @transform_0, window_bounds = array<i64: 16, 128>}, {transform_indices = @transform_1, window_bounds = array<i64: 16, 128>}, {transform_indices = @transform_2, window_bounds = array<i64: 8, 128>}, {transform_indices = @transform_3, window_bounds = array<i64: 8, 128>}]} {
    %c0_i32 = arith.constant 0 : i32
    %0 = arith.cmpi eq, %arg1, %c0_i32 : i32
    %1 = arith.extui %0 : i1 to i32
    %c0_i32_0 = arith.constant 0 : i32
    %2 = arith.cmpi ne, %1, %c0_i32_0 : i32
    scf.if %2 {
      %cst_12 = arith.constant 0.000000e+00 : f32
      %31 = vector.broadcast %cst_12 : f32 to vector<8x128xf32>
      %c0_13 = arith.constant 0 : index
      %c0_14 = arith.constant 0 : index
      %32 = vector.load %arg4[%c0_13, %c0_14] : memref<8x128xf32, #tpu.memory_space<vmem>>, vector<8x128xf32>
      tpu.vector_store %arg4[%c0_13, %c0_14], %31 {strides = array<i32>} : memref<8x128xf32, #tpu.memory_space<vmem>>, vector<8x128xf32>,
      %cst_15 = arith.constant 0.000000e+00 : f32
      %33 = vector.broadcast %cst_15 : f32 to vector<8x128xf32>
      %c0_16 = arith.constant 0 : index
      %c0_17 = arith.constant 0 : index
      %34 = vector.load %arg5[%c0_16, %c0_17] : memref<8x128xf32, #tpu.memory_space<vmem>>, vector<8x128xf32>
      tpu.vector_store %arg5[%c0_16, %c0_17], %33 {strides = array<i32>} : memref<8x128xf32, #tpu.memory_space<vmem>>, vector<8x128xf32>,
    } else {
    }
    %cst = arith.constant 0.000000e+00 : f32
    %3 = vector.broadcast %cst : f32 to vector<8x128xf32>
    %c0_i32_1 = arith.constant 0 : i32
    %c16_i32 = arith.constant 16 : i32
    %4 = arith.muli %c0_i32_1, %c16_i32 : i32
    %5 = tpu.assume_multiple %4, 16 : i32
    %6 = arith.index_cast %5 : i32 to index
    %c0 = arith.constant 0 : index
    %7 = vector.load %arg2[%6, %c0] : memref<16x128xf32, #tpu.memory_space<vmem>>, vector<16x128xf32>
    %8 = arith.index_cast %5 : i32 to index
    %c0_2 = arith.constant 0 : index
    %9 = vector.load %arg3[%8, %c0_2] : memref<16x128xf32, #tpu.memory_space<vmem>>, vector<16x128xf32>
    %10 = arith.negf %7 : vector<16x128xf32>
    %11 = math.exp %10 : vector<16x128xf32>
    %cst_3 = arith.constant 1.000000e+00 : f32
    %12 = vector.broadcast %cst_3 : f32 to vector<16x128xf32>
    %13 = arith.addf %12, %11 : vector<16x128xf32>
    %14 = arith.divf %12, %13 : vector<16x128xf32>
    %15 = arith.mulf %14, %9 : vector<16x128xf32>
    %16 = arith.addf %14, %9 : vector<16x128xf32>
    %17 = vector.extract_strided_slice %15 {offsets = [0, 0], sizes = [8, 128], strides = [1, 1]} : vector<16x128xf32> to vector<8x128xf32>
    %18 = vector.extract_strided_slice %16 {offsets = [0, 0], sizes = [8, 128], strides = [1, 1]} : vector<16x128xf32> to vector<8x128xf32>
    %19 = vector.extract_strided_slice %15 {offsets = [8, 0], sizes = [8, 128], strides = [1, 1]} : vector<16x128xf32> to vector<8x128xf32>
    %20 = arith.addf %17, %19 : vector<8x128xf32>
    %21 = vector.extract_strided_slice %16 {offsets = [8, 0], sizes = [8, 128], strides = [1, 1]} : vector<16x128xf32> to vector<8x128xf32>
    %22 = arith.addf %18, %21 : vector<8x128xf32>
    %23 = arith.addf %3, %20 : vector<8x128xf32>
    %24 = arith.addf %3, %22 : vector<8x128xf32>
    %c1_i32 = arith.constant 1 : i32
    %c0_4 = arith.constant 0 : index
    %c0_5 = arith.constant 0 : index
    %25 = vector.load %arg4[%c0_4, %c0_5] : memref<8x128xf32, #tpu.memory_space<vmem>>, vector<8x128xf32>
    %26 = arith.addf %25, %23 : vector<8x128xf32>
    %c0_6 = arith.constant 0 : index
    %c0_7 = arith.constant 0 : index
    %27 = vector.load %arg4[%c0_6, %c0_7] : memref<8x128xf32, #tpu.memory_space<vmem>>, vector<8x128xf32>
    tpu.vector_store %arg4[%c0_6, %c0_7], %26 {strides = array<i32>} : memref<8x128xf32, #tpu.memory_space<vmem>>, vector<8x128xf32>,
    %c0_8 = arith.constant 0 : index
    %c0_9 = arith.constant 0 : index
    %28 = vector.load %arg5[%c0_8, %c0_9] : memref<8x128xf32, #tpu.memory_space<vmem>>, vector<8x128xf32>
    %29 = arith.addf %28, %24 : vector<8x128xf32>
    %c0_10 = arith.constant 0 : index
    %c0_11 = arith.constant 0 : index
    %30 = vector.load %arg5[%c0_10, %c0_11] : memref<8x128xf32, #tpu.memory_space<vmem>>, vector<8x128xf32>
    tpu.vector_store %arg5[%c0_10, %c0_11], %29 {strides = array<i32>} : memref<8x128xf32, #tpu.memory_space<vmem>>, vector<8x128xf32>,
    return
  }
  func.func @transform_0(%arg0: i32, %arg1: i32) -> (i32, i32) {
    %c1_i32 = arith.constant 1 : i32
    %0 = arith.muli %arg0, %c1_i32 : i32
    %1 = arith.addi %0, %arg1 : i32
    %c0_i32 = arith.constant 0 : i32
    %c0_i32_0 = arith.constant 0 : i32
    return %1, %c0_i32 : i32, i32
  }
  func.func @transform_1(%arg0: i32, %arg1: i32) -> (i32, i32) {
    %c1_i32 = arith.constant 1 : i32
    %0 = arith.muli %arg0, %c1_i32 : i32
    %1 = arith.addi %0, %arg1 : i32
    %c0_i32 = arith.constant 0 : i32
    %c0_i32_0 = arith.constant 0 : i32
    return %1, %c0_i32 : i32, i32
  }
  func.func @transform_2(%arg0: i32, %arg1: i32) -> (i32, i32) {
    %c0_i32 = arith.constant 0 : i32
    %c0_i32_0 = arith.constant 0 : i32
    return %arg0, %c0_i32 : i32, i32
  }
  func.func @transform_3(%arg0: i32, %arg1: i32) -> (i32, i32) {
    %c0_i32 = arith.constant 0 : i32
    %c0_i32_0 = arith.constant 0 : i32
    return %arg0, %c0_i32 : i32, i32
  }
}

</mosaic_0001>

<bundles_post_ra>
// kernel: dice_loss.1
= control target key start
LH: loop header
LB: loop body
LE: loop exit
PB: predicated region body
PF: predicated region fallthrough
CT: control target
= control target key end

     0   :  { %s162_s0 = inlined_call_operand.vmem [shape: f32[16,128], index: 0, kind: input, shape index: {}]   ;;  %s163_s1 = inlined_call_operand.vmem [shape: f32[16,128], index: 1, kind: input, shape index: {}]   ;;  %s164_s2 = inlined_call_operand.vmem [shape: f32[8,128], index: 2, kind: output, shape index: {0}]   ;;  %s165_s3 = inlined_call_operand.vmem [shape: f32[8,128], index: 3, kind: output, shape index: {1}]  }
   0x1   :  { %v63_v0 = vld [vmem:[%s162_s0] sm:$0xff]  ;;  %v64_v1 = vld [vmem:[%s162_s0 + $0x8] sm:$0xff] }
   0x2   :  { %v113_v2 = vmul.f32 -1.442695, %v63_v0  ;;  %v114_v3 = vmul.f32 -1.442695, %v64_v1  ;;  %v65_v8 = vld [vmem:[%s163_s1] sm:$0xff]  ;;  %v66_v9 = vld [vmem:[%s163_s1 + $0x8] sm:$0xff] }
   0x4   :  { %116 = vpow2.f32 %v113_v2 }
   0x5   :  { %118 = vpow2.f32 %v114_v3 }
  0x11   :  { %v117_v4 = vpop.eup %116 }
  0x12   :  { %v119_v5 = vpop.eup %118  ;;  %v73_v6 = vadd.f32 1.0, %v117_v4 }
  0x13   :  { %v74_v7 = vadd.f32 1.0, %v119_v5 }
  0x14   :  { %120 = vrcp.f32 %v73_v6 }
  0x15   :  { %122 = vrcp.f32 %v74_v7 }
  0x21   :  { %v121_v10 = vpop.eup %120 }
  0x22   :  { %v123_v11 = vpop.eup %122  ;;  %v79_v12 = vmul.f32 %v121_v10, %v65_v8  ;;  %v81_v13 = vadd.f32 %v121_v10, %v65_v8 }
  0x23   :  { %v80_v14 = vmul.f32 %v123_v11, %v66_v9  ;;  %v82_v15 = vadd.f32 %v123_v11, %v66_v9 }
  0x25   :  { %v83_v16 = vadd.f32 %v80_v14, %v79_v12  ;;  %v84_v17 = vadd.f32 %v82_v15, %v81_v13 }
  0x27   :  { %89 = vst [vmem:[%s164_s2] sm:$0xff] %v83_v16  ;;  %92 = vst [vmem:[%s165_s3] sm:$0xff] %v84_v17 }

</bundles_post_ra>
